<compile_context>
chip_gen: v7x
topology: tpu7x:2x2x1
jax: 0.10.0
libtpu: 0.0.40
codegen_flags: <defaults>
</compile_context>

<pallas_src>
import jax
import jax.numpy as jnp
from jax.experimental import pallas as pl
from jax.experimental.pallas import tpu as pltpu


def _round_up(x, m):
    return ((x + m - 1) // m) * m


# ----------------------------------------------------------------------------
# Kernel 1: fused (fwd || bwd) input projection, row-tiled, time-major rows.
#   acc = sum_k  in_k @ W_k  + b_cat        (f32 accumulation on the MXU)
#   xp_fwd = acc[:, :4H],  xp_bwd = acc[:, 4H:]
# For layer 0 there is one input (the features); for later layers there are two
# (previous layer's fwd/bwd streams), which fuses the inter-layer concat.
# ----------------------------------------------------------------------------
def _make_proj_kernel(n_in, H):
    def kernel(*refs):
        ins = refs[:n_in]
        ws = refs[n_in:2 * n_in]
        b_ref = refs[2 * n_in]
        of_ref = refs[2 * n_in + 1]
        ob_ref = refs[2 * n_in + 2]

        acc = jnp.dot(ins[0][...], ws[0][...],
                      preferred_element_type=jnp.float32)
        for x_ref, w_ref in zip(ins[1:], ws[1:]):
            acc = acc + jnp.dot(x_ref[...], w_ref[...],
                                preferred_element_type=jnp.float32)
        acc = acc + b_ref[...].astype(jnp.float32)
        of_ref[...] = acc[:, :4 * H].astype(of_ref.dtype)
        ob_ref[...] = acc[:, 4 * H:].astype(ob_ref.dtype)
    return kernel


def _proj(inputs, weights, bias, *, tt, n_batch, H, vmem_limit):
    """inputs: list of (T_pad*B, Din_k); weights: list of (Din_k, 8H); bias (1,8H).
    Returns xp_fwd, xp_bwd each of shape (T_pad*B, 4H), time-major row order."""
    n_in = len(inputs)
    n_rows = inputs[0].shape[0]
    tm = tt * n_batch                    # rows per tile; tt multiple of 8 => tm % 8 == 0
    grid = (n_rows // tm,)
    eight_h = 8 * H

    in_specs = [pl.BlockSpec((tm, a.shape[1]), lambda i: (i, 0)) for a in inputs]
    in_specs += [pl.BlockSpec((w.shape[0], eight_h), lambda i: (0, 0))
                 for w in weights]                       # resident weights
    in_specs.append(pl.BlockSpec((1, eight_h), lambda i: (0, 0)))   # resident bias

    return pl.pallas_call(
        _make_proj_kernel(n_in, H),
        out_shape=(jax.ShapeDtypeStruct((n_rows, 4 * H), jnp.float32),
                   jax.ShapeDtypeStruct((n_rows, 4 * H), jnp.float32)),
        grid_spec=pltpu.PrefetchScalarGridSpec(
            num_scalar_prefetch=0,
            grid=grid,
            in_specs=in_specs,
            out_specs=[pl.BlockSpec((tm, 4 * H), lambda i: (i, 0)),
                       pl.BlockSpec((tm, 4 * H), lambda i: (i, 0))],
        ),
        compiler_params=pltpu.CompilerParams(
            dimension_semantics=("parallel",),
            vmem_limit_bytes=vmem_limit),
    )(*inputs, *weights, bias)


# ----------------------------------------------------------------------------
# Kernel 2: sequential bidirectional LSTM recurrence, U timesteps per grid step.
# Forward direction walks time forward (block g), backward direction walks time
# backward (block nblk-1-g, reversed inside the block).  (h, c) live in VMEM
# scratch; masked blend x + m*(new - x) reproduces packed-sequence semantics.
# ----------------------------------------------------------------------------
def _bilstm_scan_kernel(lens_ref, xpf_ref, xpb_ref, whf_ref, whb_ref,
                        of_ref, ob_ref, h_f, c_f, h_b, c_b):
    g = pl.program_id(0)
    nblk = pl.num_programs(0)
    U, _, H = of_ref.shape

    @pl.when(g == 0)
    def _():
        h_f[...] = jnp.zeros_like(h_f)
        c_f[...] = jnp.zeros_like(c_f)
        h_b[...] = jnp.zeros_like(h_b)
        c_b[...] = jnp.zeros_like(c_b)

    lens = lens_ref[...]                        # (B, 1) int32
    whf = whf_ref[...]                          # (H, 4H), resident; load once
    whb = whb_ref[...]

    def cell(xp, w_hh, h_ref, c_ref, mask):
        # xp: (B, 4H) = x @ W_ih + b (precomputed); mask: (B, 1) in {0, 1}.
        gates = xp + jnp.dot(h_ref[...], w_hh, preferred_element_type=jnp.float32)
        i_g = jax.nn.sigmoid(gates[:, 0:H])
        f_g = jax.nn.sigmoid(gates[:, H:2 * H])
        g_g = jnp.tanh(gates[:, 2 * H:3 * H])
        o_g = jax.nn.sigmoid(gates[:, 3 * H:4 * H])
        c_new = f_g * c_ref[...] + i_g * g_g
        h_new = o_g * jnp.tanh(c_new)
        # Masked state update (padded steps keep previous h, c): x + m*(new-x).
        c_ref[...] += mask * (c_new - c_ref[...])
        h_ref[...] += mask * (h_new - h_ref[...])
        return mask * h_new                     # zero at padded steps

    base_f = g * U
    base_b = (nblk - 1 - g) * U
    for u in range(U):                          # static unroll of U timesteps
        mask_f = jnp.where(lens > base_f + u, 1.0, 0.0).astype(jnp.float32)
        mask_b = jnp.where(lens > base_b + (U - 1 - u), 1.0, 0.0).astype(jnp.float32)
        of_ref[u] = cell(xpf_ref[u].astype(jnp.float32), whf, h_f, c_f,
                         mask_f).astype(of_ref.dtype)
        ob_ref[U - 1 - u] = cell(xpb_ref[U - 1 - u].astype(jnp.float32), whb,
                                 h_b, c_b, mask_b).astype(ob_ref.dtype)


def _bilstm_scan(xpf, xpb, w_hh_f, w_hh_b, lens2, *, U, vmem_limit):
    """xpf/xpb: (T_pad, B, 4H) time-major pre-activations.  Returns
    out_f, out_b of shape (T_pad, B, H), time-major, zero at padded steps."""
    T_pad, B, fourH = xpf.shape
    H = fourH // 4
    nblk = T_pad // U

    return pl.pallas_call(
        _bilstm_scan_kernel,
        out_shape=(jax.ShapeDtypeStruct((T_pad, B, H), jnp.float32),
                   jax.ShapeDtypeStruct((T_pad, B, H), jnp.float32)),
        grid_spec=pltpu.PrefetchScalarGridSpec(
            num_scalar_prefetch=0,
            grid=(nblk,),
            in_specs=[
                pl.BlockSpec((B, 1), lambda g: (0, 0)),                    # lengths
                pl.BlockSpec((U, B, 4 * H), lambda g: (g, 0, 0)),          # fwd xp
                pl.BlockSpec((U, B, 4 * H), lambda g: (nblk - 1 - g, 0, 0)),  # bwd xp
                pl.BlockSpec((H, 4 * H), lambda g: (0, 0)),                # W_hh fwd
                pl.BlockSpec((H, 4 * H), lambda g: (0, 0)),                # W_hh bwd
            ],
            out_specs=[
                pl.BlockSpec((U, B, H), lambda g: (g, 0, 0)),
                pl.BlockSpec((U, B, H), lambda g: (nblk - 1 - g, 0, 0)),
            ],
            scratch_shapes=[pltpu.VMEM((B, H), jnp.float32)] * 4,          # h_f,c_f,h_b,c_b
        ),
        compiler_params=pltpu.CompilerParams(
            dimension_semantics=("arbitrary",),    # sequential recurrence
            vmem_limit_bytes=vmem_limit),
    )(lens2, xpf, xpb, w_hh_f, w_hh_b)


# ----------------------------------------------------------------------------
# Encoder forward
# ----------------------------------------------------------------------------
def encoder_forward(xs, ilens, params, *, src_ilayer, trg_ilayer,
                    unroll=8, target_proj_rows=512,
                    vmem_limit=48 * 1024 * 1024):
    """Pallas equivalent of Encoder.forward.

    xs: (B, Tmax, idim) padded features; ilens: python list of lengths (desc).
    Returns (output, output_src, output_trg, hlens).
    """
    lens = jnp.asarray(ilens, jnp.int32)
    B = xs.shape[0]
    tmax = int(max(ilens))                 # pad_packed_sequence trims to max length

    # Tiling: U timesteps unrolled per scan grid step; tt timesteps (tt*B rows)
    # per projection tile; tt is a multiple of U so T_pad serves both kernels.
    U = max(1, int(unroll))
    tt_target = max(U, _round_up(max(target_proj_rows // max(B, 1), 1), U))
    tt = min(tt_target, _round_up(tmax, U))
    T_pad = _round_up(tmax, tt)
    n_rows = T_pad * B

    # Single batch-major -> time-major transpose at encoder entry.
    x_t = jnp.transpose(xs[:, :tmax], (1, 0, 2)).astype(jnp.float32)   # (tmax,B,idim)
    if T_pad != tmax:
        x_t = jnp.pad(x_t, ((0, T_pad - tmax), (0, 0), (0, 0)))
    lens2 = lens.reshape(B, 1)

    layer_outs = []                        # list of (out_f, out_b), time-major
    prev = None
    for p in params:
        H = p["w_hh_f"].shape[0]
        w_cat = jnp.concatenate([p["w_ih_f"], p["w_ih_b"]], axis=1)       # (Din, 8H)
        b_cat = jnp.concatenate([p["b_f"], p["b_b"]], axis=0)[None, :]    # (1, 8H)

        if prev is None:
            ins = [x_t.reshape(n_rows, x_t.shape[-1])]      # free reshape (leading dims)
            ws = [w_cat]
        else:
            pf, pb = prev
            Hp = pf.shape[-1]
            ins = [pf.reshape(n_rows, Hp), pb.reshape(n_rows, Hp)]
            ws = [w_cat[:Hp], w_cat[Hp:]]                   # fused inter-layer concat

        xpf2, xpb2 = _proj(ins, ws, b_cat, tt=tt, n_batch=B, H=H,
                           vmem_limit=vmem_limit)
        xpf = xpf2.reshape(T_pad, B, 4 * H)
        xpb = xpb2.reshape(T_pad, B, 4 * H)

        prev = _bilstm_scan(xpf, xpb, p["w_hh_f"], p["w_hh_b"], lens2,
                            U=U, vmem_limit=vmem_limit)
        layer_outs.append(prev)

    def to_batch_major(pair):
        f, b = pair
        y = jnp.concatenate([f[:tmax], b[:tmax]], axis=-1)    # (tmax, B, 2H)
        return jnp.transpose(y, (1, 0, 2)).astype(xs.dtype)   # (B, tmax, 2H)

    output = to_batch_major(layer_outs[-1])
    output_src = to_batch_major(layer_outs[src_ilayer - 1])
    output_trg = to_batch_major(layer_outs[trg_ilayer - 1])
    return output, output_src, output_trg, lens


# ----------------------------------------------------------------------------
# Pure-JAX reference (for correctness checking)
# ----------------------------------------------------------------------------
def _blstm_ref(x, lens, p):
    B, T, D = x.shape
    H = p["w_hh_f"].shape[0]
    hp = jax.lax.Precision.HIGHEST

    def run(xs_t, mask_t, w_ih, w_hh, b):
        def step(carry, inp):
            h, c = carry
            xt, m = inp
            gates = (jnp.dot(xt, w_ih, precision=hp) + b
                     + jnp.dot(h, w_hh, precision=hp))
            i_g = jax.nn.sigmoid(gates[:, :H])
            f_g = jax.nn.sigmoid(gates[:, H:2 * H])
            g_g = jnp.tanh(gates[:, 2 * H:3 * H])
            o_g = jax.nn.sigmoid(gates[:, 3 * H:])
            c_new = f_g * c + i_g * g_g
            h_new = o_g * jnp.tanh(c_new)
            c = c + m * (c_new - c)
            h = h + m * (h_new - h)
            return (h, c), m * h_new
        init = (jnp.zeros((B, H), jnp.float32), jnp.zeros((B, H), jnp.float32))
        _, ys = jax.lax.scan(step, init, (xs_t, mask_t))
        return ys                                            # (T, B, H)

    xs_t = jnp.transpose(x, (1, 0, 2)).astype(jnp.float32)
    mask_t = (jnp.arange(T)[:, None, None] < lens[None, :, None]).astype(jnp.float32)
    yf = run(xs_t, mask_t, p["w_ih_f"], p["w_hh_f"], p["b_f"])
    yb = run(xs_t[::-1], mask_t[::-1], p["w_ih_b"], p["w_hh_b"], p["b_b"])[::-1]
    return jnp.transpose(jnp.concatenate([yf, yb], axis=-1), (1, 0, 2)).astype(x.dtype)


def encoder_ref(xs, ilens, params, *, src_ilayer, trg_ilayer):
    lens = jnp.asarray(ilens, jnp.int32)
    outputs = []
    h = xs
    for p in params:
        h = _blstm_ref(h, lens, p)
        outputs.append(h)
    tmax = int(max(ilens))
    return (outputs[-1][:, :tmax], outputs[src_ilayer - 1][:, :tmax],
            outputs[trg_ilayer - 1][:, :tmax], lens)


# ----------------------------------------------------------------------------
if __name__ == "__main__":
    B, Tmax, idim = 2, 8, 32
    eunits, elayers = 32, 2            # small stand-in for the defaults (512, 8)
    src_ilayer, trg_ilayer = 2, 1
    H = eunits // 2

    key = jax.random.PRNGKey(0)
    keys = list(jax.random.split(key, 1 + 6 * elayers))
    x = jax.random.normal(keys[0], (B, Tmax, idim), jnp.float32)

    def uniform(k, shape, fan):
        s = 1.0 / float(fan) ** 0.5
        return jax.random.uniform(k, shape, jnp.float32, -s, s)

    # Per-layer per-direction params in "x @ W" orientation (torch W.T);
    # b_* is the combined b_ih + b_hh.
    params = []
    in_dim = idim
    ki = 1
    for _ in range(elayers):
        params.append({
            "w_ih_f": uniform(keys[ki + 0], (in_dim, 4 * H), in_dim),
            "w_hh_f": uniform(keys[ki + 1], (H, 4 * H), H),
            "b_f":    uniform(keys[ki + 2], (4 * H,), H),
            "w_ih_b": uniform(keys[ki + 3], (in_dim, 4 * H), in_dim),
            "w_hh_b": uniform(keys[ki + 4], (H, 4 * H), H),
            "b_b":    uniform(keys[ki + 5], (4 * H,), H),
        })
        ki += 6
        in_dim = eunits

    # Two length configurations: full-length and one that exercises the
    # tmax-trim + time-padding path.
    for ilens in ([8, 6], [7, 4]):
        out, out_src, out_trg, hlens = encoder_forward(
            x, ilens, params, src_ilayer=src_ilayer, trg_ilayer=trg_ilayer)
        out = jax.block_until_ready(out)

        ref, ref_src, ref_trg, _ = encoder_ref(
            x, ilens, params, src_ilayer=src_ilayer, trg_ilayer=trg_ilayer)

        tmax = max(ilens)
        assert out.shape == (B, tmax, eunits)
        assert jnp.allclose(out, ref, atol=2e-4, rtol=2e-4), "output mismatch"
        assert jnp.allclose(out_src, ref_src, atol=2e-4, rtol=2e-4), "output_src mismatch"
        assert jnp.allclose(out_trg, ref_trg, atol=2e-4, rtol=2e-4), "output_trg mismatch"
        assert jnp.array_equal(hlens, jnp.asarray(ilens, jnp.int32))

    # TODO(synk): dropout / use_batch_norm are defined but unused in the
    # reference forward; omitted here too.
    print("KERNEL_OK")
</pallas_src>

<mosaic_0001>
module attributes {stable_mosaic.version = 11 : i64} {
  func.func @kernel(%arg0: i32, %arg1: memref<16x32xf32, #tpu.memory_space<vmem>>, %arg2: memref<32x128xf32, #tpu.memory_space<vmem>>, %arg3: memref<1x128xf32, #tpu.memory_space<vmem>>, %arg4: memref<16x64xf32, #tpu.memory_space<vmem>>, %arg5: memref<16x64xf32, #tpu.memory_space<vmem>>) attributes {dimension_semantics = [#tpu.dimension_semantics<parallel>], iteration_bounds = array<i64: 1>, scalar_prefetch = 0 : i64, scratch_operands = 0 : i64, tpu.core_type = #tpu.core_type<tc>, window_params = [{transform_indices = @transform_0, window_bounds = array<i64: 16, 32>}, {pipeline_mode = #tpu.pipeline_mode<synchronous>, transform_indices = @transform_1, window_bounds = array<i64: 32, 128>}, {pipeline_mode = #tpu.pipeline_mode<synchronous>, transform_indices = @transform_2, window_bounds = array<i64: 1, 128>}, {transform_indices = @transform_3, window_bounds = array<i64: 16, 64>}, {transform_indices = @transform_4, window_bounds = array<i64: 16, 64>}]} {
    %c0 = arith.constant 0 : index
    %c0_0 = arith.constant 0 : index
    %0 = vector.load %arg1[%c0, %c0_0] : memref<16x32xf32, #tpu.memory_space<vmem>>, vector<16x32xf32>
    %c0_1 = arith.constant 0 : index
    %c0_2 = arith.constant 0 : index
    %1 = vector.load %arg2[%c0_1, %c0_2] : memref<32x128xf32, #tpu.memory_space<vmem>>, vector<32x128xf32>
    %cst = arith.constant dense<0.000000e+00> : vector<16x128xf32>
    %2 = tpu.matmul %0, %1, %cst {dimension_numbers = #tpu.dot_dimension_numbers<[1], [0], [0], [1], [0, 0, 1, 1], [], []>} : vector<16x32xf32>, vector<32x128xf32>, vector<16x128xf32> -> vector<16x128xf32>
    %c0_3 = arith.constant 0 : index
    %c0_4 = arith.constant 0 : index
    %3 = vector.load %arg3[%c0_3, %c0_4] : memref<1x128xf32, #tpu.memory_space<vmem>>, vector<1x128xf32>
    %4 = vector.broadcast %3 : vector<1x128xf32> to vector<16x128xf32>
    %5 = arith.addf %2, %4 : vector<16x128xf32>
    %6 = vector.extract_strided_slice %5 {offsets = [0, 0], sizes = [16, 64], strides = [1, 1]} : vector<16x128xf32> to vector<16x64xf32>
    %c0_5 = arith.constant 0 : index
    %c0_6 = arith.constant 0 : index
    %7 = vector.load %arg4[%c0_5, %c0_6] : memref<16x64xf32, #tpu.memory_space<vmem>>, vector<16x64xf32>
    tpu.vector_store %arg4[%c0_5, %c0_6], %6 {strides = array<i32>} : memref<16x64xf32, #tpu.memory_space<vmem>>, vector<16x64xf32>,
    %8 = vector.extract_strided_slice %5 {offsets = [0, 64], sizes = [16, 64], strides = [1, 1]} : vector<16x128xf32> to vector<16x64xf32>
    %c0_7 = arith.constant 0 : index
    %c0_8 = arith.constant 0 : index
    %9 = vector.load %arg5[%c0_7, %c0_8] : memref<16x64xf32, #tpu.memory_space<vmem>>, vector<16x64xf32>
    tpu.vector_store %arg5[%c0_7, %c0_8], %8 {strides = array<i32>} : memref<16x64xf32, #tpu.memory_space<vmem>>, vector<16x64xf32>,
    return
  }
  func.func @transform_0(%arg0: i32) -> (i32, i32) {
    %c0_i32 = arith.constant 0 : i32
    %c0_i32_0 = arith.constant 0 : i32
    return %arg0, %c0_i32 : i32, i32
  }
  func.func @transform_1(%arg0: i32) -> (i32, i32) {
    %c0_i32 = arith.constant 0 : i32
    %c0_i32_0 = arith.constant 0 : i32
    %c0_i32_1 = arith.constant 0 : i32
    return %c0_i32, %c0_i32_0 : i32, i32
  }
  func.func @transform_2(%arg0: i32) -> (i32, i32) {
    %c0_i32 = arith.constant 0 : i32
    %c0_i32_0 = arith.constant 0 : i32
    %c0_i32_1 = arith.constant 0 : i32
    return %c0_i32, %c0_i32_0 : i32, i32
  }
  func.func @transform_3(%arg0: i32) -> (i32, i32) {
    %c0_i32 = arith.constant 0 : i32
    %c0_i32_0 = arith.constant 0 : i32
    return %arg0, %c0_i32 : i32, i32
  }
  func.func @transform_4(%arg0: i32) -> (i32, i32) {
    %c0_i32 = arith.constant 0 : i32
    %c0_i32_0 = arith.constant 0 : i32
    return %arg0, %c0_i32 : i32, i32
  }
}

</mosaic_0001>

<bundles_post_ra>
// kernel: tpu_custom_call.1
= control target key start
LH: loop header
LB: loop body
LE: loop exit
PB: predicated region body
PF: predicated region fallthrough
CT: control target
= control target key end

     0   :  { %10 = vsyncpa [#allocation3], 0  ;;  %s418_s0 = inlined_call_operand.hbm [shape: f32[16,32], index: 0, kind: input, shape index: {}]   ;;  %s419_s1 = inlined_call_operand.hbm [shape: f32[32,128], index: 1, kind: input, shape index: {}]   ;;  %s420_s2 = inlined_call_operand.vmem [shape: f32[1,128], index: 2, kind: input, shape index: {}]   ;;  %s421_s3 = inlined_call_operand.hbm [shape: f32[16,64], index: 3, kind: output, shape index: {0}]   ;;  %s422_s4 = inlined_call_operand.hbm [shape: f32[16,64], index: 4, kind: output, shape index: {1}]  }
   0x1   :  { %11 = vsyncpa [#allocation6], 0 }
   0x2   :  { %12 = vsyncpa [#allocation4], 0 }
   0x3   :  { %13 = vsyncpa [#allocation9], 0  ;;  %s319_s15 = smov [#allocation2]   ;;  %s223_s19 = scalar_lea.hbm %s418_s0, 256 }
   0x4   :  { %s19_s16 = sshll.u32 %s319_s15, 4  ;;  %p224_p0 = scmp.ne.s32.totalorder %s418_s0, %s223_s19  ;;  %s20_s16 = int_to_ptr.vmem [resolvable:$true] %s19_s16 }
   0x5   :  { %p227_p1 = scmp.lt.u32.totalorder %s223_s19, %s418_s0 }
   0x7   :  { %p229_p2 = pnand %p227_p1, %p224_p0 }
   0x9   :  { %232 = shalt.err (!%p229_p2)
}
   0xa   :  { %s233_s24 = scalar_lea.vmem %s20_s16, 256  ;;  %p238_p4 = scmp.lt.s32.totalorder %s20_s16, %s20_s16 }
   0xb   :  { %p234_p3 = scmp.ne.s32.totalorder %s20_s16, %s233_s24  ;;  %p239_p5 = scmp.lt.s32.totalorder %s233_s24, %s233_s24 }
   0xd   :  { %p240_p6 = por %p239_p5, %p238_p4 }
   0xf   :  { %p241_p7 = pnand %p240_p6, %p234_p3 }
  0x11   :  { %244 = shalt.err (!%p241_p7)
}
  0x12   :  { %s320_s25 = smov 128   ;;  %s321_s26 = smov 8  }
  0x13   :  { %25 = dma.hbm_to_vmem [thread:$0]  %s418_s0, 256, %s20_s16, [#allocation3], %s320_s25, %s320_s25, %s321_s26  }
  0x14   :  { %s322_s29 = smov [#allocation5]   ;;  %s245_s7 = scalar_lea.hbm %s419_s1, 512 }
  0x15   :  { %s31_s30 = sshll.u32 %s322_s29, 4  ;;  %p246_p8 = scmp.ne.s32.totalorder %s419_s1, %s245_s7  ;;  %s32_s30 = int_to_ptr.vmem [resolvable:$true] %s31_s30 }
  0x16   :  { %p249_p9 = scmp.lt.u32.totalorder %s245_s7, %s419_s1 }
  0x18   :  { %p251_p10 = pnand %p249_p9, %p246_p8 }
  0x1a   :  { %254 = shalt.err (!%p251_p10)
}
  0x1b   :  { %s255_s12 = scalar_lea.vmem %s32_s30, 512  ;;  %p260_p12 = scmp.lt.s32.totalorder %s32_s30, %s32_s30 }
  0x1c   :  { %p256_p11 = scmp.ne.s32.totalorder %s32_s30, %s255_s12  ;;  %p261_p13 = scmp.lt.s32.totalorder %s255_s12, %s255_s12 }
  0x1e   :  { %p262_p0 = por %p261_p13, %p260_p12 }
  0x20   :  { %p263_p1 = pnand %p262_p0, %p256_p11 }
  0x22   :  { %266 = shalt.err (!%p263_p1)
}
  0x23   :  { %37 = dma.hbm_to_vmem [thread:$0]  %s419_s1, 512, %s32_s30, [#allocation6], %s320_s25, %s320_s25, %s321_s26  }
  0x24   :  { %311 = dma.done.wait [#allocation3], 256  }
  0x25   :  { %312 = vsyncadd [#allocation3], 4294967040 }
  0x26   :  { %313 = dma.done.wait [#allocation6], 512  }
  0x27   :  { %314 = vsyncadd [#allocation6], 4294966784  ;;  %vm59_vm0 = vcmask 261120   ;;  %v48_v0 = vld [vmem:[#allocation5] sm:$0xff]  ;;  %v49_v1 = vld [vmem:[#allocation5 + $0x8] sm:$0xff]  ;;  %s323_s15 = smov [#allocation7]  }
  0x28   :  { %v50_v2 = vld [vmem:[#allocation5 + $0x10] sm:$0xff]  ;;  %v208_v3 = vpack.c.bf16 %v49_v1, %v48_v0  ;;  %v51_v4 = vld [vmem:[#allocation5 + $0x18] sm:$0xff]  ;;  %s159_s16 = sshll.u32 %s323_s15, 4  ;;  %vm141_vm1 = vcmask 523264   ;;  %s324_s17 = smov 64   ;;  %s160_s16 = int_to_ptr.vmem [resolvable:$true] %s159_s16 }
  0x29   :  { %v46_v5 = vld [vmem:[#allocation2] sm:$0xff]  ;;  %v212_v6 = vpack.c.bf16 %v51_v4, %v50_v2  ;;  %v47_v7 = vld [vmem:[#allocation2 + $0x8] sm:$0xff]  ;;  %s267_s18 = scalar_lea.vmem %s160_s16, 256  ;;  %p272_p3 = scmp.lt.s32.totalorder %s160_s16, %s160_s16 }
  0x2a   :  { %205 = vmatprep.mubr.msk.f32.mxu0 %vm59_vm0, %v46_v5  ;;  %209 = vmatprep.subr.bf16.mxu0 %v208_v3  ;;  %v188_v8 = vld [vmem:[%s420_s2] ss:$0 sm:$0xff]  ;;  %p268_p2 = scmp.ne.s32.totalorder %s160_s16, %s267_s18  ;;  %p273_p4 = scmp.lt.s32.totalorder %s267_s18, %s267_s18 }
  0x2b   :  { %211 = vmatpush3.bf16.msra.mxu0 %v208_v3 }
  0x2c   :  { %213 = vmatprep.subr.bf16.mxu0 %v212_v6  ;;  %p274_p5 = por %p273_p4, %p272_p3 }
  0x2e   :  { %p275_p6 = pnand %p274_p5, %p268_p2 }
  0x2f   :  { %215 = vmatpush3.bf16.msra.mxu0 %v212_v6 }
  0x32   :  { %206 = vmatmul.mubr.msk.f32.vlgmr.msra.gmra.mrb[0].mxu0 %vm59_vm0, %v47_v7 }
 0x105   :  { %v207_v9 = vpop.f32.mrb[0].mxu0 }
 0x106   :  { %v138_v10 = vadd.f32 %v207_v9, %v188_v8  ;;  %v132_v11 = vpop.f32.mrb[1].mxu0 }
 0x107   :  { %v133_v12 = vadd.f32 %v188_v8, %v132_v11 }
 0x108   :  { %143 = vst.msk [vmem:[#allocation7 + $0x8] sm:$0xff] %vm141_vm1, %v138_v10 }
 0x109   :  { %146 = vrot.lane.b32.xlu0 %v133_v12, %s324_s17  ;;  %142 = vst.msk [vmem:[#allocation7] sm:$0xff] %vm141_vm1, %v133_v12 }
 0x10a   :  { %278 = shalt.err (!%p275_p6)
}
 0x10b   :  { %s279_s20 = scalar_lea.hbm %s421_s3, 256 }
 0x10c   :  { %p280_p7 = scmp.ne.s32.totalorder %s421_s3, %s279_s20  ;;  %p283_p8 = scmp.lt.u32.totalorder %s279_s20, %s421_s3 }
 0x10e   :  { %p285_p9 = pnand %p283_p8, %p280_p7 }
 0x110   :  { %288 = shalt.err (!%p285_p9)
}
 0x111   :  { %165 = dma.vmem_to_hbm [thread:$0]  %s160_s16, 256, %s421_s3, [#allocation4], %s320_s25, %s320_s25, %s321_s26  }
 0x112   :  { %148 = vrot.lane.b32.xlu0 %v138_v10, %s324_s17  ;;  %s325_s29 = smov [#allocation8]  }
 0x113   :  { %s171_s30 = sshll.u32 %s325_s29, 4  ;;  %s172_s30 = int_to_ptr.vmem [resolvable:$true] %s171_s30 }
 0x114   :  { %s289_s5 = scalar_lea.vmem %s172_s30, 256  ;;  %p294_p11 = scmp.lt.s32.totalorder %s172_s30, %s172_s30 }
 0x115   :  { %p290_p10 = scmp.ne.s32.totalorder %s172_s30, %s289_s5  ;;  %p295_p12 = scmp.lt.s32.totalorder %s289_s5, %s289_s5 }
 0x117   :  { %p296_p13 = por %p295_p12, %p294_p11 }
 0x119   :  { %p297_p0 = pnand %p296_p13, %p290_p10 }
 0x17b   :  { %v147_v13 = vpop.permute.xlu0 %146 }
 0x17c   :  { %152 = vst.msk [vmem:[#allocation8] sm:$0xff] %vm141_vm1, %v147_v13 }
 0x184   :  { %v149_v14 = vpop.permute.xlu0 %148 }
 0x185   :  { %153 = vst.msk [vmem:[#allocation8 + $0x8] sm:$0xff] %vm141_vm1, %v149_v14 }
 0x186   :  { %300 = shalt.err (!%p297_p0)
}
 0x187   :  { %s301_s3 = scalar_lea.hbm %s422_s4, 256 }
 0x188   :  { %p302_p1 = scmp.ne.s32.totalorder %s422_s4, %s301_s3  ;;  %p305_p2 = scmp.lt.u32.totalorder %s301_s3, %s422_s4 }
 0x18a   :  { %p307_p3 = pnand %p305_p2, %p302_p1 }
 0x18c   :  { %310 = shalt.err (!%p307_p3)
}
 0x18d   :  { %177 = dma.vmem_to_hbm [thread:$0]  %s172_s30, 256, %s422_s4, [#allocation9], %s320_s25, %s320_s25, %s321_s26  }
 0x18e   :  { %315 = dma.done.wait [#allocation4], 256  }
 0x18f   :  { %316 = vsyncadd [#allocation4], 4294967040 }
 0x190   :  { %317 = dma.done.wait [#allocation9], 256  }
 0x191   :  { %318 = vsyncadd [#allocation9], 4294967040 }
 0x192   :  { %184 = vsyncpa [#allocation3], 1 }
 0x193   :  { %185 = vsyncpa [#allocation6], 1 }
 0x194   :  { %186 = vsyncpa [#allocation4], 1 }
 0x195   :  { %187 = vsyncpa [#allocation9], 1 }

</bundles_post_ra>
